<compile_context>
chip_gen: v7x
topology: tpu7x:2x2x1
jax: 0.10.0
libtpu: 0.0.40
codegen_flags: <defaults>
</compile_context>

<pallas_src>
import jax
import jax.numpy as jnp
from jax import lax
from jax.experimental import pallas as pl
from jax.experimental.pallas import tpu as pltpu

AUX_WEIGHT = 0.4    # weight of outputs[0] cross-entropy
MAIN_WEIGHT = 1.0   # weight of outputs[1] cross-entropy
VMEM_BUDGET = 24 * 1024 * 1024   # conservative: fits v7x's 32 MiB scoped default


def _pick_tile(n, cin, k2):
    """Largest lane-dense spatial tile that divides n and fits the VMEM budget."""
    def bytes_for(t):
        # double-buffered x / labels / two logit outputs + lane-wide accumulators
        per_step = (cin + 2 * k2 + 1) * t * 4
        return 2 * per_step + 4 * t * 4 + 2 * (k2 * cin + k2) * 4
    for t in (2048, 1024, 512, 256, 128):
        if n % t == 0 and bytes_for(t) <= VMEM_BUDGET:
            return t
    return n   # block == full dim is always legal (small / odd spatial sizes)


# --------------------------------------------------------------------------
# Fused kernel: dual 1x1-conv heads + masked CE (both heads) + pixel accuracy
# Layout: channels on sublanes, spatial (B*H*W, tiled) on lanes.
# --------------------------------------------------------------------------
def _fused_head_loss_kernel(x_ref, w_ref, b_ref, lab_ref,
                            out0_ref, out1_ref,
                            ce0_ref, ce1_ref, hit_ref, cnt_ref,
                            ce0_acc, ce1_acc, hit_acc, cnt_acc):
    j = pl.program_id(1)

    @pl.when(j == 0)
    def _init():
        ce0_acc[...] = jnp.zeros_like(ce0_acc)
        ce1_acc[...] = jnp.zeros_like(ce1_acc)
        hit_acc[...] = jnp.zeros_like(hit_acc)
        cnt_acc[...] = jnp.zeros_like(cnt_acc)

    x = x_ref[0]                       # (Cin, TILE_N)
    wc = w_ref[...]                    # (2K, Cin)  -- both heads stacked
    bc = b_ref[...]                    # (2K, 1)

    # Both heads in one (tiny) MXU push; output already channels-first.
    logits = jnp.dot(wc, x, preferred_element_type=jnp.float32) + bc   # (2K, TILE_N)

    k = out0_ref.shape[1]
    tile_n = logits.shape[1]
    l0 = logits[:k]                    # aux head   (K, TILE_N)
    l1 = logits[k:]                    # main head  (K, TILE_N)

    # Lane-dense stores (last dim = TILE_N, multiple of 128).
    out0_ref[0] = l0.astype(out0_ref.dtype)
    out1_ref[0] = l1.astype(out1_ref.dtype)

    labels = lab_ref[0]                # (1, TILE_N) int32
    valid = labels >= 0
    valid_f = valid.astype(jnp.float32)
    safe_lab = jnp.where(valid, labels, 0)

    cls_idx = lax.broadcasted_iota(jnp.int32, (k, tile_n), 0)      # class on sublanes
    onehot = (cls_idx == safe_lab).astype(jnp.float32)             # (K, TILE_N)

    def masked_ce(l):
        m = jnp.max(l, axis=0, keepdims=True)
        lse = jnp.log(jnp.sum(jnp.exp(l - m), axis=0, keepdims=True)) + m
        picked = jnp.sum(l * onehot, axis=0, keepdims=True)
        return (lse - picked) * valid_f                            # (1, TILE_N)

    ce0_acc[...] += masked_ce(l0)
    ce1_acc[...] += masked_ce(l1)

    # argmax over classes (first maximal index, matching torch.max tie-break)
    maxv = jnp.max(l1, axis=0, keepdims=True)
    idx_or_big = jnp.where(l1 == maxv, cls_idx, jnp.int32(k))
    preds = jnp.min(idx_or_big, axis=0, keepdims=True)             # (1, TILE_N)
    hit_acc[...] += jnp.logical_and(preds == labels, valid).astype(jnp.float32)
    cnt_acc[...] += valid_f

    @pl.when(j == pl.num_programs(1) - 1)
    def _finalize():
        ce0_ref[0] = jnp.sum(ce0_acc[...], keepdims=True)
        ce1_ref[0] = jnp.sum(ce1_acc[...], keepdims=True)
        hit_ref[0] = jnp.sum(hit_acc[...], keepdims=True)
        cnt_ref[0] = jnp.sum(cnt_acc[...], keepdims=True)


# --------------------------------------------------------------------------
# FullModel forward (wrapper: free reshapes only, plus tiny partial combine)
# --------------------------------------------------------------------------
def full_model_forward(x_nchw, labels, params):
    w0, b0, w1, b1 = params            # w: (Cin, K), b: (1, K)
    B, C, H, W = x_nchw.shape
    K = w0.shape[1]
    N = H * W
    K2 = 2 * K

    x3 = x_nchw.reshape(B, C, N)                        # free reshape of NCHW
    lab3 = labels.reshape(B, 1, N).astype(jnp.int32)    # lane-dense labels

    w_cat = jnp.concatenate([w0.T, w1.T], axis=0)       # (2K, Cin)
    b_cat = jnp.concatenate([b0.T, b1.T], axis=0)       # (2K, 1)

    TILE_N = _pick_tile(N, C, K2)
    grid = (B, N // TILE_N)

    cost = pl.CostEstimate(
        flops=2 * B * N * C * K2 + 16 * B * N * K,
        transcendentals=2 * B * N * K,
        bytes_accessed=B * N * (C + K2 + 1) * 4 + (K2 * C + K2) * 4,
    )

    (out0_f, out1_f, ce0_p, ce1_p, hit_p, cnt_p) = pl.pallas_call(
        _fused_head_loss_kernel,
        out_shape=(
            jax.ShapeDtypeStruct((B, K, N), jnp.float32),
            jax.ShapeDtypeStruct((B, K, N), jnp.float32),
            jax.ShapeDtypeStruct((B, 1, 1), jnp.float32),
            jax.ShapeDtypeStruct((B, 1, 1), jnp.float32),
            jax.ShapeDtypeStruct((B, 1, 1), jnp.float32),
            jax.ShapeDtypeStruct((B, 1, 1), jnp.float32),
        ),
        grid_spec=pltpu.PrefetchScalarGridSpec(
            num_scalar_prefetch=0,
            grid=grid,
            in_specs=[
                pl.BlockSpec((1, C, TILE_N), lambda b, j: (b, 0, j)),
                pl.BlockSpec((K2, C), lambda b, j: (0, 0)),
                pl.BlockSpec((K2, 1), lambda b, j: (0, 0)),
                pl.BlockSpec((1, 1, TILE_N), lambda b, j: (b, 0, j)),
            ],
            out_specs=(
                pl.BlockSpec((1, K, TILE_N), lambda b, j: (b, 0, j)),
                pl.BlockSpec((1, K, TILE_N), lambda b, j: (b, 0, j)),
                pl.BlockSpec((1, 1, 1), lambda b, j: (b, 0, 0)),
                pl.BlockSpec((1, 1, 1), lambda b, j: (b, 0, 0)),
                pl.BlockSpec((1, 1, 1), lambda b, j: (b, 0, 0)),
                pl.BlockSpec((1, 1, 1), lambda b, j: (b, 0, 0)),
            ),
            scratch_shapes=[pltpu.VMEM((1, TILE_N), jnp.float32)] * 4,
        ),
        compiler_params=pltpu.CompilerParams(
            dimension_semantics=("parallel", "arbitrary"),
            vmem_limit_bytes=32 * 1024 * 1024,
        ),
        cost_estimate=cost,
    )(x3, w_cat, b_cat, lab3)

    # Tiny cross-batch combine (also merges per-TensorCore partials on v7x).
    ce0 = jnp.sum(ce0_p)
    ce1 = jnp.sum(ce1_p)
    hit = jnp.sum(hit_p)
    cnt = jnp.sum(cnt_p)
    loss = (AUX_WEIGHT * ce0 + MAIN_WEIGHT * ce1) / (cnt + 1e-10)
    acc = hit / (cnt + 1e-10)

    out0 = out0_f.reshape(B, K, H, W)   # already channels-first -> free reshape
    out1 = out1_f.reshape(B, K, H, W)

    return loss.reshape(1), (out0, out1), acc     # torch.unsqueeze(loss, 0)


# --------------------------------------------------------------------------
# Pure-JAX reference for a sanity check
# --------------------------------------------------------------------------
def _reference(x_nchw, labels, params):
    w0, b0, w1, b1 = params
    B, C, H, W = x_nchw.shape
    xf = jnp.transpose(x_nchw, (0, 2, 3, 1)).reshape(-1, C)
    l0 = xf @ w0 + b0[0]
    l1 = xf @ w1 + b1[0]
    lab = labels.reshape(-1)
    valid = lab >= 0
    safe = jnp.where(valid, lab, 0)

    def ce_sum(l):
        lse = jax.nn.logsumexp(l, axis=-1)
        picked = l[jnp.arange(l.shape[0]), safe]
        return jnp.sum((lse - picked) * valid)

    cnt = jnp.sum(valid).astype(jnp.float32)
    loss = (AUX_WEIGHT * ce_sum(l0) + MAIN_WEIGHT * ce_sum(l1)) / (cnt + 1e-10)
    preds = jnp.argmax(l1, axis=-1)
    acc = jnp.sum((preds == lab) & valid).astype(jnp.float32) / (cnt + 1e-10)
    return loss, acc, l0, l1


if __name__ == "__main__":
    key = jax.random.PRNGKey(0)
    k_x, k_lab, k_w0, k_b0, k_w1, k_b1 = jax.random.split(key, 6)

    B, Cin, H, W, K = 2, 4, 16, 16, 8
    x = jax.random.normal(k_x, (B, Cin, H, W), dtype=jnp.float32)
    # labels in [-1, K); -1 acts as "ignore" (label < 0 -> invalid pixel)
    labels = jax.random.randint(k_lab, (B, H, W), -1, K, dtype=jnp.int32)

    params = (
        0.5 * jax.random.normal(k_w0, (Cin, K), dtype=jnp.float32),
        0.1 * jax.random.normal(k_b0, (1, K), dtype=jnp.float32),
        0.5 * jax.random.normal(k_w1, (Cin, K), dtype=jnp.float32),
        0.1 * jax.random.normal(k_b1, (1, K), dtype=jnp.float32),
    )

    loss, outputs, acc = jax.block_until_ready(
        full_model_forward(x, labels, params))

    ref_loss, ref_acc, ref_l0, ref_l1 = _reference(x, labels, params)
    assert loss.shape == (1,)
    assert outputs[0].shape == (B, K, H, W) and outputs[1].shape == (B, K, H, W)
    out0_rows = jnp.transpose(outputs[0], (0, 2, 3, 1)).reshape(-1, K)
    out1_rows = jnp.transpose(outputs[1], (0, 2, 3, 1)).reshape(-1, K)
    assert jnp.allclose(out0_rows, ref_l0, atol=1e-4, rtol=1e-4)
    assert jnp.allclose(out1_rows, ref_l1, atol=1e-4, rtol=1e-4)
    assert jnp.allclose(loss[0], ref_loss, atol=1e-4, rtol=1e-4)
    assert jnp.allclose(acc, ref_acc, atol=1e-5, rtol=1e-5)

    print("KERNEL_OK")
</pallas_src>

<mosaic_0001>
module attributes {stable_mosaic.version = 11 : i64} {
  func.func @_fused_head_loss_kernel(%arg0: i32, %arg1: i32, %arg2: memref<1x4x256xf32, #tpu.memory_space<vmem>>, %arg3: memref<16x4xf32, #tpu.memory_space<vmem>>, %arg4: memref<16x1xf32, #tpu.memory_space<vmem>>, %arg5: memref<1x1x256xi32, #tpu.memory_space<vmem>>, %arg6: memref<1x8x256xf32, #tpu.memory_space<vmem>>, %arg7: memref<1x8x256xf32, #tpu.memory_space<vmem>>, %arg8: memref<1x1x1xf32, #tpu.memory_space<vmem>>, %arg9: memref<1x1x1xf32, #tpu.memory_space<vmem>>, %arg10: memref<1x1x1xf32, #tpu.memory_space<vmem>>, %arg11: memref<1x1x1xf32, #tpu.memory_space<vmem>>, %arg12: memref<1x256xf32, #tpu.memory_space<vmem>>, %arg13: memref<1x256xf32, #tpu.memory_space<vmem>>, %arg14: memref<1x256xf32, #tpu.memory_space<vmem>>, %arg15: memref<1x256xf32, #tpu.memory_space<vmem>>) attributes {dimension_semantics = [#tpu.dimension_semantics<parallel>, #tpu.dimension_semantics<arbitrary>], iteration_bounds = array<i64: 2, 1>, scalar_prefetch = 0 : i64, scratch_operands = 4 : i64, tpu.core_type = #tpu.core_type<tc>, window_params = [{transform_indices = @transform_0, window_bounds = array<i64: 1, 4, 256>}, {pipeline_mode = #tpu.pipeline_mode<synchronous>, transform_indices = @transform_1, window_bounds = array<i64: 16, 4>}, {pipeline_mode = #tpu.pipeline_mode<synchronous>, transform_indices = @transform_2, window_bounds = array<i64: 16, 1>}, {transform_indices = @transform_3, window_bounds = array<i64: 1, 1, 256>}, {transform_indices = @transform_4, window_bounds = array<i64: 1, 8, 256>}, {transform_indices = @transform_5, window_bounds = array<i64: 1, 8, 256>}, {transform_indices = @transform_6, window_bounds = array<i64: 1, 1, 1>}, {transform_indices = @transform_7, window_bounds = array<i64: 1, 1, 1>}, {transform_indices = @transform_8, window_bounds = array<i64: 1, 1, 1>}, {transform_indices = @transform_9, window_bounds = array<i64: 1, 1, 1>}]} {
    %c0_i32 = arith.constant 0 : i32
    %0 = arith.cmpi eq, %arg1, %c0_i32 : i32
    %1 = arith.extui %0 : i1 to i32
    %c0_i32_0 = arith.constant 0 : i32
    %2 = arith.cmpi ne, %1, %c0_i32_0 : i32
    scf.if %2 {
      %cst_44 = arith.constant 0.000000e+00 : f32
      %86 = vector.broadcast %cst_44 : f32 to vector<1x256xf32>
      %c0_45 = arith.constant 0 : index
      %c0_46 = arith.constant 0 : index
      %87 = vector.load %arg12[%c0_45, %c0_46] : memref<1x256xf32, #tpu.memory_space<vmem>>, vector<1x256xf32>
      tpu.vector_store %arg12[%c0_45, %c0_46], %86 {strides = array<i32>} : memref<1x256xf32, #tpu.memory_space<vmem>>, vector<1x256xf32>,
      %cst_47 = arith.constant 0.000000e+00 : f32
      %88 = vector.broadcast %cst_47 : f32 to vector<1x256xf32>
      %c0_48 = arith.constant 0 : index
      %c0_49 = arith.constant 0 : index
      %89 = vector.load %arg13[%c0_48, %c0_49] : memref<1x256xf32, #tpu.memory_space<vmem>>, vector<1x256xf32>
      tpu.vector_store %arg13[%c0_48, %c0_49], %88 {strides = array<i32>} : memref<1x256xf32, #tpu.memory_space<vmem>>, vector<1x256xf32>,
      %cst_50 = arith.constant 0.000000e+00 : f32
      %90 = vector.broadcast %cst_50 : f32 to vector<1x256xf32>
      %c0_51 = arith.constant 0 : index
      %c0_52 = arith.constant 0 : index
      %91 = vector.load %arg14[%c0_51, %c0_52] : memref<1x256xf32, #tpu.memory_space<vmem>>, vector<1x256xf32>
      tpu.vector_store %arg14[%c0_51, %c0_52], %90 {strides = array<i32>} : memref<1x256xf32, #tpu.memory_space<vmem>>, vector<1x256xf32>,
      %cst_53 = arith.constant 0.000000e+00 : f32
      %92 = vector.broadcast %cst_53 : f32 to vector<1x256xf32>
      %c0_54 = arith.constant 0 : index
      %c0_55 = arith.constant 0 : index
      %93 = vector.load %arg15[%c0_54, %c0_55] : memref<1x256xf32, #tpu.memory_space<vmem>>, vector<1x256xf32>
      tpu.vector_store %arg15[%c0_54, %c0_55], %92 {strides = array<i32>} : memref<1x256xf32, #tpu.memory_space<vmem>>, vector<1x256xf32>,
    } else {
    }
    %c0 = arith.constant 0 : index
    %c0_1 = arith.constant 0 : index
    %c0_2 = arith.constant 0 : index
    %3 = vector.load %arg2[%c0, %c0_1, %c0_2] : memref<1x4x256xf32, #tpu.memory_space<vmem>>, vector<1x4x256xf32>
    %4 = vector.shape_cast %3 : vector<1x4x256xf32> to vector<4x256xf32>
    %c0_3 = arith.constant 0 : index
    %c0_4 = arith.constant 0 : index
    %5 = vector.load %arg3[%c0_3, %c0_4] : memref<16x4xf32, #tpu.memory_space<vmem>>, vector<16x4xf32>
    %c0_5 = arith.constant 0 : index
    %c0_6 = arith.constant 0 : index
    %6 = vector.load %arg4[%c0_5, %c0_6] : memref<16x1xf32, #tpu.memory_space<vmem>>, vector<16x1xf32>
    %cst = arith.constant dense<0.000000e+00> : vector<16x256xf32>
    %7 = tpu.matmul %5, %4, %cst {dimension_numbers = #tpu.dot_dimension_numbers<[1], [0], [0], [1], [0, 0, 1, 1], [], []>} : vector<16x4xf32>, vector<4x256xf32>, vector<16x256xf32> -> vector<16x256xf32>
    %8 = vector.broadcast %6 : vector<16x1xf32> to vector<16x256xf32>
    %9 = arith.addf %7, %8 : vector<16x256xf32>
    %10 = vector.extract_strided_slice %9 {offsets = [0, 0], sizes = [8, 256], strides = [1, 1]} : vector<16x256xf32> to vector<8x256xf32>
    %11 = vector.extract_strided_slice %9 {offsets = [8, 0], sizes = [8, 256], strides = [1, 1]} : vector<16x256xf32> to vector<8x256xf32>
    %c0_7 = arith.constant 0 : index
    %c0_8 = arith.constant 0 : index
    %c0_9 = arith.constant 0 : index
    %12 = vector.load %arg6[%c0_7, %c0_8, %c0_9] : memref<1x8x256xf32, #tpu.memory_space<vmem>>, vector<1x8x256xf32>
    %13 = vector.shape_cast %12 : vector<1x8x256xf32> to vector<8x256xf32>
    %14 = vector.shape_cast %10 : vector<8x256xf32> to vector<1x8x256xf32>
    tpu.vector_store %arg6[%c0_7, %c0_8, %c0_9], %14 {strides = array<i32>} : memref<1x8x256xf32, #tpu.memory_space<vmem>>, vector<1x8x256xf32>,
    %c0_10 = arith.constant 0 : index
    %c0_11 = arith.constant 0 : index
    %c0_12 = arith.constant 0 : index
    %15 = vector.load %arg7[%c0_10, %c0_11, %c0_12] : memref<1x8x256xf32, #tpu.memory_space<vmem>>, vector<1x8x256xf32>
    %16 = vector.shape_cast %15 : vector<1x8x256xf32> to vector<8x256xf32>
    %17 = vector.shape_cast %11 : vector<8x256xf32> to vector<1x8x256xf32>
    tpu.vector_store %arg7[%c0_10, %c0_11, %c0_12], %17 {strides = array<i32>} : memref<1x8x256xf32, #tpu.memory_space<vmem>>, vector<1x8x256xf32>,
    %c0_13 = arith.constant 0 : index
    %c0_14 = arith.constant 0 : index
    %c0_15 = arith.constant 0 : index
    %18 = vector.load %arg5[%c0_13, %c0_14, %c0_15] : memref<1x1x256xi32, #tpu.memory_space<vmem>>, vector<1x1x256xi32>
    %19 = vector.shape_cast %18 : vector<1x1x256xi32> to vector<1x256xi32>
    %c0_i32_16 = arith.constant 0 : i32
    %20 = vector.broadcast %c0_i32_16 : i32 to vector<1x256xi32>
    %21 = arith.cmpi sge, %19, %20 : vector<1x256xi32>
    %22 = arith.extui %21 : vector<1x256xi1> to vector<1x256xi32>
    %23 = arith.sitofp %22 : vector<1x256xi32> to vector<1x256xf32>
    %c0_i32_17 = arith.constant 0 : i32
    %24 = vector.broadcast %c0_i32_17 : i32 to vector<1x256xi32>
    %25 = arith.select %21, %19, %24 : vector<1x256xi1>, vector<1x256xi32>
    %26 = tpu.iota {dimensions = array<i32: 0>} : vector<8x256xi32>
    %27 = vector.broadcast %25 : vector<1x256xi32> to vector<8x256xi32>
    %28 = arith.cmpi eq, %26, %27 : vector<8x256xi32>
    %29 = arith.extui %28 : vector<8x256xi1> to vector<8x256xi32>
    %30 = arith.sitofp %29 : vector<8x256xi32> to vector<8x256xf32>
    %c0_18 = arith.constant 0 : index
    %c0_19 = arith.constant 0 : index
    %31 = vector.load %arg12[%c0_18, %c0_19] : memref<1x256xf32, #tpu.memory_space<vmem>>, vector<1x256xf32>
    %cst_20 = arith.constant dense<0xFF800000> : vector<256xf32>
    %32 = vector.multi_reduction <maximumf>, %10, %cst_20 [0] : vector<8x256xf32> to vector<256xf32>
    %33 = vector.shape_cast %32 : vector<256xf32> to vector<1x256xf32>
    %34 = vector.broadcast %33 : vector<1x256xf32> to vector<8x256xf32>
    %35 = arith.subf %10, %34 : vector<8x256xf32>
    %36 = math.exp %35 : vector<8x256xf32>
    %cst_21 = arith.constant dense<0.000000e+00> : vector<256xf32>
    %37 = vector.multi_reduction <add>, %36, %cst_21 [0] : vector<8x256xf32> to vector<256xf32>
    %38 = vector.shape_cast %37 : vector<256xf32> to vector<1x256xf32>
    %39 = math.log %38 : vector<1x256xf32>
    %40 = arith.addf %39, %33 : vector<1x256xf32>
    %41 = arith.mulf %10, %30 : vector<8x256xf32>
    %cst_22 = arith.constant dense<0.000000e+00> : vector<256xf32>
    %42 = vector.multi_reduction <add>, %41, %cst_22 [0] : vector<8x256xf32> to vector<256xf32>
    %43 = vector.shape_cast %42 : vector<256xf32> to vector<1x256xf32>
    %44 = arith.subf %40, %43 : vector<1x256xf32>
    %45 = arith.mulf %44, %23 : vector<1x256xf32>
    %46 = arith.addf %31, %45 : vector<1x256xf32>
    %c0_23 = arith.constant 0 : index
    %c0_24 = arith.constant 0 : index
    %47 = vector.load %arg12[%c0_23, %c0_24] : memref<1x256xf32, #tpu.memory_space<vmem>>, vector<1x256xf32>
    tpu.vector_store %arg12[%c0_23, %c0_24], %46 {strides = array<i32>} : memref<1x256xf32, #tpu.memory_space<vmem>>, vector<1x256xf32>,
    %c0_25 = arith.constant 0 : index
    %c0_26 = arith.constant 0 : index
    %48 = vector.load %arg13[%c0_25, %c0_26] : memref<1x256xf32, #tpu.memory_space<vmem>>, vector<1x256xf32>
    %cst_27 = arith.constant dense<0xFF800000> : vector<256xf32>
    %49 = vector.multi_reduction <maximumf>, %11, %cst_27 [0] : vector<8x256xf32> to vector<256xf32>
    %50 = vector.shape_cast %49 : vector<256xf32> to vector<1x256xf32>
    %51 = vector.broadcast %50 : vector<1x256xf32> to vector<8x256xf32>
    %52 = arith.subf %11, %51 : vector<8x256xf32>
    %53 = math.exp %52 : vector<8x256xf32>
    %cst_28 = arith.constant dense<0.000000e+00> : vector<256xf32>
    %54 = vector.multi_reduction <add>, %53, %cst_28 [0] : vector<8x256xf32> to vector<256xf32>
    %55 = vector.shape_cast %54 : vector<256xf32> to vector<1x256xf32>
    %56 = math.log %55 : vector<1x256xf32>
    %57 = arith.addf %56, %50 : vector<1x256xf32>
    %58 = arith.mulf %11, %30 : vector<8x256xf32>
    %cst_29 = arith.constant dense<0.000000e+00> : vector<256xf32>
    %59 = vector.multi_reduction <add>, %58, %cst_29 [0] : vector<8x256xf32> to vector<256xf32>
    %60 = vector.shape_cast %59 : vector<256xf32> to vector<1x256xf32>
    %61 = arith.subf %57, %60 : vector<1x256xf32>
    %62 = arith.mulf %61, %23 : vector<1x256xf32>
    %63 = arith.addf %48, %62 : vector<1x256xf32>
    %c0_30 = arith.constant 0 : index
    %c0_31 = arith.constant 0 : index
    %64 = vector.load %arg13[%c0_30, %c0_31] : memref<1x256xf32, #tpu.memory_space<vmem>>, vector<1x256xf32>
    tpu.vector_store %arg13[%c0_30, %c0_31], %63 {strides = array<i32>} : memref<1x256xf32, #tpu.memory_space<vmem>>, vector<1x256xf32>,
    %cst_32 = arith.constant dense<0xFF800000> : vector<256xf32>
    %65 = vector.multi_reduction <maximumf>, %11, %cst_32 [0] : vector<8x256xf32> to vector<256xf32>
    %66 = vector.shape_cast %65 : vector<256xf32> to vector<1x256xf32>
    %67 = vector.broadcast %66 : vector<1x256xf32> to vector<8x256xf32>
    %68 = arith.cmpf oeq, %11, %67 : vector<8x256xf32>
    %c8_i32 = arith.constant 8 : i32
    %69 = vector.broadcast %c8_i32 : i32 to vector<8x256xi32>
    %70 = arith.select %68, %26, %69 : vector<8x256xi1>, vector<8x256xi32>
    %cst_33 = arith.constant dense<2147483647> : vector<256xi32>
    %71 = vector.multi_reduction <minsi>, %70, %cst_33 [0] : vector<8x256xi32> to vector<256xi32>
    %72 = vector.shape_cast %71 : vector<256xi32> to vector<1x256xi32>
    %c0_34 = arith.constant 0 : index
    %c0_35 = arith.constant 0 : index
    %73 = vector.load %arg14[%c0_34, %c0_35] : memref<1x256xf32, #tpu.memory_space<vmem>>, vector<1x256xf32>
    %74 = arith.cmpi eq, %72, %19 : vector<1x256xi32>
    %75 = arith.andi %74, %21 : vector<1x256xi1>
    %76 = arith.extui %75 : vector<1x256xi1> to vector<1x256xi32>
    %77 = arith.sitofp %76 : vector<1x256xi32> to vector<1x256xf32>
    %78 = arith.addf %73, %77 : vector<1x256xf32>
    %c0_36 = arith.constant 0 : index
    %c0_37 = arith.constant 0 : index
    %79 = vector.load %arg14[%c0_36, %c0_37] : memref<1x256xf32, #tpu.memory_space<vmem>>, vector<1x256xf32>
    tpu.vector_store %arg14[%c0_36, %c0_37], %78 {strides = array<i32>} : memref<1x256xf32, #tpu.memory_space<vmem>>, vector<1x256xf32>,
    %c0_38 = arith.constant 0 : index
    %c0_39 = arith.constant 0 : index
    %80 = vector.load %arg15[%c0_38, %c0_39] : memref<1x256xf32, #tpu.memory_space<vmem>>, vector<1x256xf32>
    %81 = arith.addf %80, %23 : vector<1x256xf32>
    %c0_40 = arith.constant 0 : index
    %c0_41 = arith.constant 0 : index
    %82 = vector.load %arg15[%c0_40, %c0_41] : memref<1x256xf32, #tpu.memory_space<vmem>>, vector<1x256xf32>
    tpu.vector_store %arg15[%c0_40, %c0_41], %81 {strides = array<i32>} : memref<1x256xf32, #tpu.memory_space<vmem>>, vector<1x256xf32>,
    %c0_i32_42 = arith.constant 0 : i32
    %83 = arith.cmpi eq, %arg1, %c0_i32_42 : i32
    %84 = arith.extui %83 : i1 to i32
    %c0_i32_43 = arith.constant 0 : i32
    %85 = arith.cmpi ne, %84, %c0_i32_43 : i32
    scf.if %85 {
      %c0_44 = arith.constant 0 : index
      %c0_45 = arith.constant 0 : index
      %86 = vector.load %arg12[%c0_44, %c0_45] : memref<1x256xf32, #tpu.memory_space<vmem>>, vector<1x256xf32>
      %87 = vector.shape_cast %86 : vector<1x256xf32> to vector<1x1x256xf32>
      %cst_46 = arith.constant dense<0.000000e+00> : vector<1xf32>
      %88 = vector.multi_reduction <add>, %87, %cst_46 [1, 2] : vector<1x1x256xf32> to vector<1xf32>
      %89 = vector.shape_cast %88 : vector<1xf32> to vector<1x1x1xf32>
      %90 = vector.extract %89[0, 0, 0] : f32 from vector<1x1x1xf32>
      %91 = vector.broadcast %90 : f32 to vector<1x1xf32>
      %c0_47 = arith.constant 0 : index
      %c0_48 = arith.constant 0 : index
      %c0_49 = arith.constant 0 : index
      %92 = vector.load %arg8[%c0_47, %c0_48, %c0_49] : memref<1x1x1xf32, #tpu.memory_space<vmem>>, vector<1x1x1xf32>
      %93 = vector.shape_cast %92 : vector<1x1x1xf32> to vector<1x1xf32>
      %94 = vector.shape_cast %91 : vector<1x1xf32> to vector<1x1x1xf32>
      tpu.vector_store %arg8[%c0_47, %c0_48, %c0_49], %94 {strides = array<i32>} : memref<1x1x1xf32, #tpu.memory_space<vmem>>, vector<1x1x1xf32>,
      %c0_50 = arith.constant 0 : index
      %c0_51 = arith.constant 0 : index
      %95 = vector.load %arg13[%c0_50, %c0_51] : memref<1x256xf32, #tpu.memory_space<vmem>>, vector<1x256xf32>
      %96 = vector.shape_cast %95 : vector<1x256xf32> to vector<1x1x256xf32>
      %cst_52 = arith.constant dense<0.000000e+00> : vector<1xf32>
      %97 = vector.multi_reduction <add>, %96, %cst_52 [1, 2] : vector<1x1x256xf32> to vector<1xf32>
      %98 = vector.shape_cast %97 : vector<1xf32> to vector<1x1x1xf32>
      %99 = vector.extract %98[0, 0, 0] : f32 from vector<1x1x1xf32>
      %100 = vector.broadcast %99 : f32 to vector<1x1xf32>
      %c0_53 = arith.constant 0 : index
      %c0_54 = arith.constant 0 : index
      %c0_55 = arith.constant 0 : index
      %101 = vector.load %arg9[%c0_53, %c0_54, %c0_55] : memref<1x1x1xf32, #tpu.memory_space<vmem>>, vector<1x1x1xf32>
      %102 = vector.shape_cast %101 : vector<1x1x1xf32> to vector<1x1xf32>
      %103 = vector.shape_cast %100 : vector<1x1xf32> to vector<1x1x1xf32>
      tpu.vector_store %arg9[%c0_53, %c0_54, %c0_55], %103 {strides = array<i32>} : memref<1x1x1xf32, #tpu.memory_space<vmem>>, vector<1x1x1xf32>,
      %c0_56 = arith.constant 0 : index
      %c0_57 = arith.constant 0 : index
      %104 = vector.load %arg14[%c0_56, %c0_57] : memref<1x256xf32, #tpu.memory_space<vmem>>, vector<1x256xf32>
      %105 = vector.shape_cast %104 : vector<1x256xf32> to vector<1x1x256xf32>
      %cst_58 = arith.constant dense<0.000000e+00> : vector<1xf32>
      %106 = vector.multi_reduction <add>, %105, %cst_58 [1, 2] : vector<1x1x256xf32> to vector<1xf32>
      %107 = vector.shape_cast %106 : vector<1xf32> to vector<1x1x1xf32>
      %108 = vector.extract %107[0, 0, 0] : f32 from vector<1x1x1xf32>
      %109 = vector.broadcast %108 : f32 to vector<1x1xf32>
      %c0_59 = arith.constant 0 : index
      %c0_60 = arith.constant 0 : index
      %c0_61 = arith.constant 0 : index
      %110 = vector.load %arg10[%c0_59, %c0_60, %c0_61] : memref<1x1x1xf32, #tpu.memory_space<vmem>>, vector<1x1x1xf32>
      %111 = vector.shape_cast %110 : vector<1x1x1xf32> to vector<1x1xf32>
      %112 = vector.shape_cast %109 : vector<1x1xf32> to vector<1x1x1xf32>
      tpu.vector_store %arg10[%c0_59, %c0_60, %c0_61], %112 {strides = array<i32>} : memref<1x1x1xf32, #tpu.memory_space<vmem>>, vector<1x1x1xf32>,
      %c0_62 = arith.constant 0 : index
      %c0_63 = arith.constant 0 : index
      %113 = vector.load %arg15[%c0_62, %c0_63] : memref<1x256xf32, #tpu.memory_space<vmem>>, vector<1x256xf32>
      %114 = vector.shape_cast %113 : vector<1x256xf32> to vector<1x1x256xf32>
      %cst_64 = arith.constant dense<0.000000e+00> : vector<1xf32>
      %115 = vector.multi_reduction <add>, %114, %cst_64 [1, 2] : vector<1x1x256xf32> to vector<1xf32>
      %116 = vector.shape_cast %115 : vector<1xf32> to vector<1x1x1xf32>
      %117 = vector.extract %116[0, 0, 0] : f32 from vector<1x1x1xf32>
      %118 = vector.broadcast %117 : f32 to vector<1x1xf32>
      %c0_65 = arith.constant 0 : index
      %c0_66 = arith.constant 0 : index
      %c0_67 = arith.constant 0 : index
      %119 = vector.load %arg11[%c0_65, %c0_66, %c0_67] : memref<1x1x1xf32, #tpu.memory_space<vmem>>, vector<1x1x1xf32>
      %120 = vector.shape_cast %119 : vector<1x1x1xf32> to vector<1x1xf32>
      %121 = vector.shape_cast %118 : vector<1x1xf32> to vector<1x1x1xf32>
      tpu.vector_store %arg11[%c0_65, %c0_66, %c0_67], %121 {strides = array<i32>} : memref<1x1x1xf32, #tpu.memory_space<vmem>>, vector<1x1x1xf32>,
    } else {
    }
    return
  }
  func.func @transform_0(%arg0: i32, %arg1: i32) -> (i32, i32, i32) {
    %c0_i32 = arith.constant 0 : i32
    %c0_i32_0 = arith.constant 0 : i32
    return %arg0, %c0_i32, %arg1 : i32, i32, i32
  }
  func.func @transform_1(%arg0: i32, %arg1: i32) -> (i32, i32) {
    %c0_i32 = arith.constant 0 : i32
    %c0_i32_0 = arith.constant 0 : i32
    %c0_i32_1 = arith.constant 0 : i32
    return %c0_i32, %c0_i32_0 : i32, i32
  }
  func.func @transform_2(%arg0: i32, %arg1: i32) -> (i32, i32) {
    %c0_i32 = arith.constant 0 : i32
    %c0_i32_0 = arith.constant 0 : i32
    %c0_i32_1 = arith.constant 0 : i32
    return %c0_i32, %c0_i32_0 : i32, i32
  }
  func.func @transform_3(%arg0: i32, %arg1: i32) -> (i32, i32, i32) {
    %c0_i32 = arith.constant 0 : i32
    %c0_i32_0 = arith.constant 0 : i32
    return %arg0, %c0_i32, %arg1 : i32, i32, i32
  }
  func.func @transform_4(%arg0: i32, %arg1: i32) -> (i32, i32, i32) {
    %c0_i32 = arith.constant 0 : i32
    %c0_i32_0 = arith.constant 0 : i32
    return %arg0, %c0_i32, %arg1 : i32, i32, i32
  }
  func.func @transform_5(%arg0: i32, %arg1: i32) -> (i32, i32, i32) {
    %c0_i32 = arith.constant 0 : i32
    %c0_i32_0 = arith.constant 0 : i32
    return %arg0, %c0_i32, %arg1 : i32, i32, i32
  }
  func.func @transform_6(%arg0: i32, %arg1: i32) -> (i32, i32, i32) {
    %c0_i32 = arith.constant 0 : i32
    %c0_i32_0 = arith.constant 0 : i32
    %c0_i32_1 = arith.constant 0 : i32
    return %arg0, %c0_i32, %c0_i32_0 : i32, i32, i32
  }
  func.func @transform_7(%arg0: i32, %arg1: i32) -> (i32, i32, i32) {
    %c0_i32 = arith.constant 0 : i32
    %c0_i32_0 = arith.constant 0 : i32
    %c0_i32_1 = arith.constant 0 : i32
    return %arg0, %c0_i32, %c0_i32_0 : i32, i32, i32
  }
  func.func @transform_8(%arg0: i32, %arg1: i32) -> (i32, i32, i32) {
    %c0_i32 = arith.constant 0 : i32
    %c0_i32_0 = arith.constant 0 : i32
    %c0_i32_1 = arith.constant 0 : i32
    return %arg0, %c0_i32, %c0_i32_0 : i32, i32, i32
  }
  func.func @transform_9(%arg0: i32, %arg1: i32) -> (i32, i32, i32) {
    %c0_i32 = arith.constant 0 : i32
    %c0_i32_0 = arith.constant 0 : i32
    %c0_i32_1 = arith.constant 0 : i32
    return %arg0, %c0_i32, %c0_i32_0 : i32, i32, i32
  }
}

</mosaic_0001>

<bundles_post_ra>
// kernel: tpu_custom_call.1
= control target key start
LH: loop header
LB: loop body
LE: loop exit
PB: predicated region body
PF: predicated region fallthrough
CT: control target
= control target key end

     0   :  { %s1822_s0 = inlined_call_operand.vmem [shape: f32[2,4,256], index: 0, kind: input, shape index: {}]   ;;  %s1823_s1 = inlined_call_operand.vmem [shape: f32[16,4], index: 1, kind: input, shape index: {}]   ;;  %s1824_s2 = inlined_call_operand.vmem [shape: f32[16,1], index: 2, kind: input, shape index: {}]   ;;  %s1825_s3 = inlined_call_operand.vmem [shape: s32[2,1,256], index: 3, kind: input, shape index: {}]   ;;  %s1826_s4 = inlined_call_operand.hbm [shape: f32[2,8,256], index: 4, kind: output, shape index: {0}]   ;;  %s1827_s5 = inlined_call_operand.hbm [shape: f32[2,8,256], index: 5, kind: output, shape index: {1}]   ;;  %s1828_s6 = inlined_call_operand.vmem [shape: f32[2,1,1], index: 6, kind: output, shape index: {2}]   ;;  %s1829_s7 = inlined_call_operand.vmem [shape: f32[2,1,1], index: 7, kind: output, shape index: {3}]   ;;  %s1830_s8 = inlined_call_operand.vmem [shape: f32[2,1,1], index: 8, kind: output, shape index: {4}]   ;;  %s1831_s9 = inlined_call_operand.vmem [shape: f32[2,1,1], index: 9, kind: output, shape index: {5}]  }
   0x1   :  { %1833 = sst [smem:[#allocation12_spill]] %s1822_s0 }
   0x2   :  { %1834 = sst [smem:[#allocation13_spill]] %s1823_s1 }
   0x3   :  { %1835 = sst [smem:[#allocation14_spill]] %s1824_s2 }
   0x4   :  { %1836 = sst [smem:[#allocation15_spill]] %s1825_s3 }
   0x5   :  { %1837 = sst [smem:[#allocation16_spill]] %s1826_s4 }
   0x6   :  { %15 = vsyncpa [#allocation7], 0 }
   0x7   :  { %17 = vsyncpa [#allocation7 + $0x1], 0 }
   0x8   :  { %18 = vsyncpa [#allocation9], 0 }
   0x9   :  { %20 = vsyncpa [#allocation9 + $0x1], 0  ;;  %s1482_s30 = smov 0   ;;  %s1484_s10 = smov 0  }
   0xa   :  { %s1486_s11 = smov 0   ;;  %s1488_s12 = smov 0  }
   0xb   :  { %s1490_s13 = smov 0   ;;  %s1492_s14 = smov 0  }
   0xc LB: > { %s1194_s15 = sadd.s32 4294967295, %s1425_s14   ;;  %s1195_s16 = sadd.s32 4294967294, %s1425_s14   ;;  %s1425_s14 = sphi %s1492_s14, %s26_s14   ;;  %s1421_s13 = sphi %s1490_s13, %s1856_s13   ;;  %s1417_s12 = sphi %s1488_s12, %s1855_s12   ;;  %s1413_s11 = sphi %s1486_s11, %s1854_s11   ;;  %s1409_s10 = sphi %s1484_s10, %s1853_s10   ;;  %s1405_s30 = sphi %s1482_s30, %s1852_s30  }
   0xd   : > { %s38_s17 = sadd.s32 1, %s1421_s13  ;;  %s145_s18 = sadd.s32 1, %s1413_s11 }
   0xe   : > { %p40_p0 = scmp.ge.s32.totalorder %s38_s17, 2  ;;  %p155_p1 = scmp.ne.s32.totalorder %s1413_s11, %s1409_s10 }
   0xf   : > { %p156_p2 = scmp.eq.s32.totalorder %s1194_s15, 1  ;;  %p161_p3 = scmp.ne.s32.totalorder %s1409_s10, %s1405_s30 }
  0x10   : > { %s1858_s17 = smov (%p40_p0, %s38_s17), 0  ;;  %p162_p5 = scmp.eq.s32.totalorder %s1195_s16, 1 }
  0x11   : > { %p1522_p4 = por %p156_p2, %p155_p1  ;;  %s140_s20 = ssub.s32 %s1421_s13, %s1858_s17 }
  0x12   : > { %p1198_p6 = scmp.ge.s32.totalorder %s1425_s14, 1  ;;  %p143_p7 = scmp.eq.s32.totalorder %s140_s20, 0 }
  0x13   : > { %p1529_p8 = por %p162_p5, %p161_p3  ;;  %p343_p9 = scmp.lt.s32.totalorder %s1425_s14, 3 }
  0x14   : > { %s1535_s22 = scalar_select %p143_p7, %s1413_s11, %s145_s18  }
  0x15   : > { %p344_p10 = pnand %p1198_p6, %p343_p9 }
  0x16   : > { %p409_p11 = scmp.lt.s32.totalorder (!%p344_p10), %s1417_s12, 1  ;;  %v445_v0 = vlaneseq (!%p344_p10)  ;;  %v1427_v1 = vmov (!%p344_p10), 0.0   ;;  %s1840_s2 = sld [smem:[#allocation14_spill]] (!%p344_p10)  ;;  %v1428_v3 = vmov (!%p344_p10), 0   ;;  %vm477_vm1 = vcmask (!%p344_p10), 1043456  }
  0x17   : > { %347 = sbr.rel (%p344_p10) target bundleno = 548 (0x224), region = 36  ;;  %546 = vmatprep.mubr.f32.mxu0 (!%p344_p10), %v1427_v1  ;;  %552 = vmatprep.mubr.f32.mxu1 (!%p344_p10), %v1427_v1  ;;  %s1843_s0 = sld [smem:[#allocation12_spill]] (!%p344_p10)  ;;  %vm470_vm3 = vcmask (!%p344_p10), 31744  }
  0x18   : > { %1297 = vset.pattern.permute.xlu0 (!%p344_p10), %v1428_v3  ;;  %vm1546_vm0 = vcmp.lt.s32.totalorder (!%p344_p10), %v445_v0, 256  ;;  %v1550_v5 = vshrl.u32 (!%p344_p10), %v445_v0, 7  ;;  %s1844_s3 = sld [smem:[#allocation15_spill]] (!%p344_p10)  ;;  %s1845_s1 = sld [smem:[#allocation13_spill]] (!%p344_p10) }
  0x19   : > { %450 = vst.msk [vmem:[#allocation3] sm:$0x3] (!%p344_p10), %vm1546_vm0, %v1427_v1  ;;  %451 = vst.msk [vmem:[#allocation4] sm:$0x3] (!%p344_p10), %vm1546_vm0, %v1427_v1  ;;  %s1621_s15 = sand.u32 (!%p344_p10), 1, %s1409_s10   ;;  %s1832_s23 = sshll.u32 (!%p344_p10), %s1417_s12, 8 }
  0x1a   : > { %452 = vst.msk [vmem:[#allocation5] sm:$0x3] (!%p344_p10), %vm1546_vm0, %v1427_v1  ;;  %449 = vst.msk [vmem:[#allocation2] sm:$0x3] (!%p344_p10), %vm1546_vm0, %v1427_v1  ;;  %v1576_v7 = vsub.s32 (!%p344_p10), 0, %v1550_v5  ;;  %v1579_v8 = vsub.s32 (!%p344_p10), 1, %v1550_v5 }
  0x1b   : > { %s1199_s16 = sshll.u32 (!%p344_p10), %s1621_s15, 4  ;;  %s1850_s4 = sld [smem:[#allocation16_spill]] (!%p344_p10) }
  0x1c   : > { %v456_v2 = vld [vmem:[%s1840_s2] sm:$0xff] (!%p344_p10)  ;;  %v457_v6 = vld [vmem:[%s1840_s2 + $0x8] sm:$0xff] (!%p344_p10)  ;;  %s1633_s20 = scalar_lea.vmem (!%p344_p10), [#allocation8], %s1199_s16  ;;  %s931_s29 = scalar_lea.sflag (!%p344_p10), [#allocation7], %s1621_s15 }
  0x1d   : > { %460 = vperm.xlu0 (!%p344_p10), %1297, %v456_v2  }
  0x1e   : > { %s1544_s25 = scalar_select %p409_p11, %s1417_s12, 1  ;;  %v454_v14 = vld [vmem:[%s1845_s1] sm:$0xff]  ;;  %v455_v15 = vld [vmem:[%s1845_s1 + $0x8] sm:$0xff] }
  0x20   : > { %s1221_s26 = sshll.u32 %s1544_s25, 3  ;;  %s1203_s27 = sshll.u32 %s1544_s25, 1 }
  0x21   : > { %s416_s18 = scalar_lea.vmem %s1843_s0, %s1221_s26  ;;  %s425_s24 = scalar_lea.vmem %s1844_s3, %s1203_s27  ;;  %465 = vperm.xlu0 %1297, %v457_v6   ;;  %v818_v25 = vld [vmem:[#allocation5] sm:$0x3] }
  0x22   : > { %v453_v9 = vld [vmem:[%s416_s18] sm:$0xff]  ;;  %s1630_s18 = scalar_lea.vmem [#allocation6], %s1199_s16  ;;  %s1738_s28 = scalar_lea.hbm %s1850_s4, %s1832_s23 }
  0x23   : > { %v1581_v10 = vld [vmem:[%s425_s24] sm:$0x3]  ;;  %v469_v11 = vcombine.high %v453_v9, %v453_v9  ;;  %s964_s24 = sshll.u32 %s1630_s18, 4  ;;  %s1430_s0 = smov [#allocation6]   ;;  %s965_s24 = int_to_ptr.vmem [resolvable:$true] %s964_s24 }
  0x24   : > { %vm564_vm2 = vcmp.ge.s32.totalorder %v1581_v10, 0  ;;  %v775_v12 = vrot.slane %v1581_v10, %v1576_v7  ;;  %v779_v13 = vrot.slane %v1581_v10, %v1579_v8  ;;  %s1315_s16 = scalar_lea.vmem %s965_s24, 256  ;;  %s1319_s1 = sshll.u32 %s1430_s0, 4  ;;  %s1320_s1 = int_to_ptr.vmem [resolvable:$false] %s1319_s1 }
  0x25   : > { %v1594_v16 = vsel %vm564_vm2, 1, %v1428_v3  ;;  %v1208_v17 = vsel %vm564_vm2, 1.0, %v1427_v1  ;;  %v567_v18 = vsel %vm564_vm2, %v1581_v10, 0  ;;  %1204 = vmatprep.subr.msk.mxu0 %vm477_vm1, %v469_v11  ;;  %1224 = vmatprep.subr.msk.mxu1 %vm477_vm1, %v469_v11  ;;  %p1316_p12 = scmp.ne.s32.totalorder %s965_s24, %s1315_s16  ;;  %s1321_s2 = scalar_lea.vmem %s1320_s1, 512 }
  0x26   : > { %v573_v19 = vrot.slane %v567_v18, %v1576_v7  ;;  %v577_v20 = vrot.slane %v567_v18, %v1579_v8  ;;  %v1603_v21 = vrot.slane %v1208_v17, %v1576_v7  ;;  %1205 = vmatpush1.msk.msra.mxu0 %vm477_vm1, %v453_v9  ;;  %1225 = vmatpush1.msk.msra.mxu1 %vm477_vm1, %v453_v9  ;;  %p1322_p1 = scmp.lt.s32.totalorder %s965_s24, %s1320_s1  ;;  %p1323_p2 = scmp.lt.s32.totalorder %s1321_s2, %s1315_s16 }
  0x27   : > { %v1608_v22 = vrot.slane %v1208_v17, %v1579_v8  ;;  %v785_v23 = vrot.slane %v1594_v16, %v1576_v7  ;;  %v789_v24 = vrot.slane %v1594_v16, %v1579_v8  ;;  %1206 = vmatmul.mubr.msk.f32.vlgmr.msra.gmra.mrb[0].mxu0 %vm470_vm3, %v454_v14  ;;  %1207 = vmatmul.mubr.msk.f32.vlgmr.msra.gmra.mrb[0].mxu1 %vm470_vm3, %v455_v15  ;;  %p1317_p13 = pnand %p1316_p12, %p1522_p4 }
  0x28   : > { %vm578_vm4 = vcmp.eq.s32.totalorder %v1550_v5, %v573_v19  ;;  %vm579_vm5 = vcmp.eq.s32.totalorder %v1550_v5, %v577_v20  ;;  %v819_v26 = vadd.f32 %v1208_v17, %v818_v25  ;;  %p1324_p3 = por %p1323_p2, %p1322_p1 }
  0x29   : > { %v1209_v29 = vsel %vm578_vm4, 1.0, %v1427_v1  ;;  %v1210_v32 = vsel %vm579_vm5, 1.0, %v1427_v1  ;;  %vm1661_vm12 = vcmp.ne.s32.totalorder %v785_v23, 0  ;;  %vm1668_vm14 = vcmp.ne.s32.totalorder %v789_v24, 0  ;;  %p1318_p0 = pneg %p1317_p13 }
  0x2a   : > { %820 = vst.msk [vmem:[#allocation5] sm:$0x3] %vm1546_vm0, %v819_v26  ;;  %vm836_vm5 = vcmask 1040384  }
  0x2b   : > { %p1325_p5 = pnand %p1324_p3, %p1318_p0 }
  0x9c   : > { %v461_v27 = vpop.permute.xlu0 %460 }
  0xa0   : > { %v466_v28 = vpop.permute.xlu0 %465 }
  0xfa   : > { %v548_v30 = vpop.f32.mrb[0].mxu0  ;;  %v554_v31 = vpop.f32.mrb[0].mxu1 }
  0xfb   : > { %v549_v33 = vadd.f32 %v548_v30, %v461_v27  ;;  %v555_v34 = vadd.f32 %v554_v31, %v466_v28  ;;  %v550_v35 = vpop.f32.mrb[1].mxu0  ;;  %v556_v36 = vpop.f32.mrb[1].mxu1 }
  0xfc   : > { %v551_v37 = vadd.f32 %v550_v35, %v461_v27  ;;  %v557_v38 = vadd.f32 %v556_v36, %v466_v28 }
  0xfd   : > { %v585_v39 = vrot.slane %v549_v33, 4  ;;  %v1626_v40 = vmul.f32 %v1209_v29, %v549_v33  ;;  %v675_v41 = vrot.slane %v555_v34, 4  ;;  %v1628_v42 = vmul.f32 %v1209_v29, %v555_v34  ;;  %559 = vst [vmem:[%s1630_s18] sm:$0xff] %v549_v33  ;;  %561 = vst [vmem:[%s1633_s20] sm:$0xff] %v555_v34 }
  0xfe   : > { %v591_v43 = vrot.slane %v551_v37, 4  ;;  %v1636_v44 = vmul.f32 %v1210_v32, %v551_v37  ;;  %v681_v45 = vrot.slane %v557_v38, 4  ;;  %v1638_v46 = vmul.f32 %v1210_v32, %v557_v38  ;;  %560 = vst [vmem:[%s1630_s18 + $0x8] sm:$0xff] %v551_v37  ;;  %562 = vst [vmem:[%s1633_s20 + $0x8] sm:$0xff] %v557_v38 }
  0xff   : > { %v586_v47 = vmax.f32 %v549_v33, %v585_v39  ;;  %v676_v48 = vmax.f32 %v555_v34, %v675_v41  ;;  %v713_v10 = vrot.slane %v1628_v42, 4 }
 0x100   : > { %v592_v49 = vmax.f32 %v551_v37, %v591_v43  ;;  %v682_v50 = vmax.f32 %v557_v38, %v681_v45 }
 0x101   : > { %v587_v51 = vrot.slane %v586_v47, 2  ;;  %v677_v52 = vrot.slane %v676_v48, 2 }
 0x102   : > { %v593_v53 = vrot.slane %v592_v49, 2  ;;  %v683_v54 = vrot.slane %v682_v50, 2 }
 0x103   : > { %v588_v55 = vmax.f32 %v586_v47, %v587_v51  ;;  %v678_v56 = vmax.f32 %v676_v48, %v677_v52 }
 0x104   : > { %v594_v57 = vmax.f32 %v592_v49, %v593_v53  ;;  %v684_v58 = vmax.f32 %v682_v50, %v683_v54 }
 0x105   : > { %v589_v59 = vrot.slane %v588_v55, 1  ;;  %v679_v60 = vrot.slane %v678_v56, 1 }
 0x106   : > { %v595_v61 = vrot.slane %v594_v57, 1  ;;  %v685_v62 = vrot.slane %v684_v58, 1 }
 0x107   : > { %v1642_v63 = vmax.f32 %v588_v55, %v589_v59  ;;  %v1644_v0 = vmax.f32 %v678_v56, %v679_v60 }
 0x108   : > { %v1646_v2 = vmax.f32 %v594_v57, %v595_v61  ;;  %v1648_v3 = vmax.f32 %v684_v58, %v685_v62  ;;  %v623_v58 = vrot.slane %v1626_v40, 4 }
 0x109   : > { %v597_v6 = vsub.f32 %v549_v33, %v1642_v63  ;;  %v687_v9 = vsub.f32 %v555_v34, %v1644_v0  ;;  %vm749_vm6 = vcmp.eq.f32.partialorder %v555_v34, %v1644_v0  ;;  %v1429_v33 = vmov 1966171168  }
 0x10a   : > { %v598_v11 = vsub.f32 %v551_v37, %v1646_v2  ;;  %v688_v14 = vsub.f32 %v557_v38, %v1648_v3  ;;  %v751_v18 = vsel %vm749_vm6, %v1550_v5, 8  ;;  %vm750_vm7 = vcmp.eq.f32.partialorder %v557_v38, %v1648_v3 }
 0x10b   : > { %v599_v15 = vmul.f32 1.442695, %v597_v6  ;;  %v689_v17 = vmul.f32 1.442695, %v687_v9  ;;  %v753_v19 = vrot.slane %v751_v18, 4  ;;  %v752_v26 = vsel %vm750_vm7, %v1550_v5, 8 }
 0x10c   : > { %v601_v20 = vmul.f32 1.442695, %v598_v11  ;;  %v691_v25 = vmul.f32 1.442695, %v688_v14  ;;  %v762_v27 = vrot.slane %v752_v26, 4  ;;  %v654_v34 = vunpack.c.l.s4 %v1429_v33 }
 0x10d   : > { %1299 = vpow2.f32 %v599_v15  ;;  %vm754_vm8 = vcmp.lt.s32.totalorder %v751_v18, %v753_v19 }
 0x10e   : > { %1301 = vpow2.f32 %v689_v17  ;;  %v755_v28 = vsel %vm754_vm8, %v751_v18, %v753_v19  ;;  %vm763_vm9 = vcmp.lt.s32.totalorder %v752_v26, %v762_v27  ;;  %v655_v43 = vunpack.c.0.s8 %v654_v34 }
 0x10f   : > { %1303 = vpow2.f32 %v601_v20  ;;  %v756_v29 = vrot.slane %v755_v28, 2  ;;  %v764_v30 = vsel %vm763_vm9, %v752_v26, %v762_v27  ;;  %v719_v17 = vrot.slane %v1638_v46, 4 }
 0x110   : > { %1305 = vpow2.f32 %v691_v25  ;;  %v765_v31 = vrot.slane %v764_v30, 2  ;;  %v1682_v54 = vsub.s32 %v655_v43, %v1550_v5  ;;  %v629_v5 = vrot.slane %v1636_v44, 4 }
 0x111   : > { %vm757_vm10 = vcmp.lt.s32.totalorder %v755_v28, %v756_v29  ;;  %v624_v18 = vadd.f32 %v623_v58, %v1626_v40  ;;  %v714_v27 = vadd.f32 %v713_v10, %v1628_v42  ;;  %v720_v34 = vadd.f32 %v719_v17, %v1638_v46 }
 0x112   : > { %v758_v32 = vsel %vm757_vm10, %v755_v28, %v756_v29  ;;  %vm766_vm11 = vcmp.lt.s32.totalorder %v764_v30, %v765_v31 }
 0x113   : > { %v759_v35 = vrot.slane %v758_v32, 1  ;;  %v767_v36 = vsel %vm766_vm11, %v764_v30, %v765_v31  ;;  %v630_v30 = vadd.f32 %v629_v5, %v1636_v44  ;;  %v721_v42 = vrot.slane %v720_v34, 2 }
 0x114   : > { %v768_v38 = vrot.slane %v767_v36, 1 }
 0x115   : > { %vm760_vm13 = vcmp.lt.s32.totalorder %v758_v32, %v759_v35  ;;  %v631_v37 = vrot.slane %v630_v30, 2 }
 0x116   : > { %v761_v41 = vsel %vm760_vm13, %v758_v32, %v759_v35  ;;  %vm769_vm1 = vcmp.lt.s32.totalorder %v767_v36, %v768_v38  ;;  %v625_v35 = vrot.slane %v624_v18, 2 }
 0x117   : > { %v1300_v39 = vpop.eup %1299  ;;  %vm780_vm15 = vcmp.eq.s32.totalorder %v761_v41, %v775_v12  ;;  %v770_v50 = vsel %vm769_vm1, %v767_v36, %v768_v38  ;;  %v715_v36 = vrot.slane %v714_v27, 2  ;;  %v632_v44 = vadd.f32 %v631_v37, %v630_v30 }
 0x118   : > { %v1302_v45 = vpop.eup %1301  ;;  %v603_v48 = vrot.slane %v1300_v39, 4  ;;  %vm792_vm2 = vmand %vm780_vm15, %vm1661_vm12  ;;  %vm781_vm3 = vcmp.eq.s32.totalorder %v770_v50, %v779_v13  ;;  %v626_v38 = vadd.f32 %v625_v35, %v624_v18  ;;  %v722_v41 = vadd.f32 %v721_v42, %v720_v34 }
 0x119   : > { %v1304_v23 = vpop.eup %1303  ;;  %v693_v49 = vrot.slane %v1302_v45, 4  ;;  %v1211_v16 = vsel %vm792_vm2, 1.0, %v1427_v1  ;;  %vm793_vm4 = vmand %vm781_vm3, %vm1668_vm14 }
 0x11a   : > { %v1306_v51 = vpop.eup %1305  ;;  %v604_v52 = vadd.f32 %v1300_v39, %v603_v48  ;;  %v609_v24 = vrot.slane %v1304_v23, 4  ;;  %v1212_v57 = vsel %vm793_vm4, 1.0, %v1427_v1  ;;  %v771_v1 = vld [vmem:[#allocation4] sm:$0x3]  ;;  %v716_v39 = vadd.f32 %v715_v36, %v714_v27 }
 0x11b   : > { %v694_v53 = vadd.f32 %v1302_v45, %v693_v49  ;;  %v699_v12 = vrot.slane %v1306_v51, 4  ;;  %v800_v61 = vcombine.low %v1211_v16, %v1212_v57  ;;  %v627_v45 = vrot.slane %v626_v38, 1 }
 0x11c   : > { %v605_v55 = vrot.slane %v604_v52, 2  ;;  %v610_v56 = vadd.f32 %v1304_v23, %v609_v24  ;;  %v717_v23 = vrot.slane %v716_v39, 1 }
 0x11d   : > { %v695_v59 = vrot.slane %v694_v53, 2  ;;  %v700_v60 = vadd.f32 %v1306_v51, %v699_v12  ;;  %v807_v11 = vrot.slane %v800_v61, %v1682_v54  ;;  %v633_v51 = vrot.slane %v632_v44, 1 }
 0x11e   : > { %v606_v62 = vadd.f32 %v605_v55, %v604_v52  ;;  %v611_v13 = vrot.slane %v610_v56, 2  ;;  %v723_v12 = vrot.slane %v722_v41, 1  ;;  %v628_v58 = vadd.f32 %v627_v45, %v626_v38 }
 0x11f   : > { %v696_v6 = vadd.f32 %v695_v59, %v694_v53  ;;  %v701_v9 = vrot.slane %v700_v60, 2  ;;  %v814_v25 = vrot.slane %v807_v11, %v1682_v54  ;;  %v718_v61 = vadd.f32 %v717_v23, %v716_v39 }
 0x120   : > { %v607_v14 = vrot.slane %v606_v62, 1  ;;  %v612_v15 = vadd.f32 %v611_v13, %v610_v56  ;;  %v724_v11 = vadd.f32 %v723_v12, %v722_v41 }
 0x121   : > { %v697_v19 = vrot.slane %v696_v6, 1  ;;  %v702_v20 = vadd.f32 %v701_v9, %v700_v60  ;;  %v816_v32 = vadd.f32 %v814_v25, %v771_v1 }
 0x122   : > { %v608_v26 = vadd.f32 %v607_v14, %v606_v62  ;;  %v613_v28 = vrot.slane %v612_v15, 1 }
 0x123   : > { %v698_v29 = vadd.f32 %v697_v19, %v696_v6  ;;  %v703_v31 = vrot.slane %v702_v20, 1  ;;  %817 = vst.msk [vmem:[#allocation4] sm:$0x3] %vm1546_vm0, %v816_v32  ;;  %v634_v6 = vadd.f32 %v633_v51, %v632_v44 }
 0x124   : > { %1307 = vlog2.f32 %v608_v26  ;;  %v614_v33 = vadd.f32 %v613_v28, %v612_v15  ;;  %v674_v26 = vld [vmem:[#allocation3] sm:$0x3] }
 0x125   : > { %1309 = vlog2.f32 %v698_v29  ;;  %v704_v40 = vadd.f32 %v703_v31, %v702_v20 }
 0x126   : > { %1311 = vlog2.f32 %v614_v33 }
 0x127   : > { %1313 = vlog2.f32 %v704_v40 }
 0x12a   : > { %v878_v43 = vld [vmem:[#allocation4] sm:$0x3] }
 0x12b   : > { %v883_v46 = vrot.slane %v878_v43, %v1576_v7  ;;  %v887_v47 = vrot.slane %v878_v43, %v1579_v8 }
 0x12d   : > { %v890_v52 = vsel %vm836_vm5, %v883_v46, 0.0  ;;  %v891_v16 = vsel %vm836_vm5, %v887_v47, 0.0 }
 0x12e   : > { %v1308_v48 = vpop.eup %1307  ;;  %v892_v55 = vadd.f32 %v891_v16, %v890_v52 }
 0x12f   : > { %v1310_v49 = vpop.eup %1309  ;;  %v616_v50 = vmul.f32 0.6931472, %v1308_v48 }
 0x130   : > { %v1312_v24 = vpop.eup %1311  ;;  %v706_v53 = vmul.f32 0.6931472, %v1310_v49  ;;  %893 = vadd.xlane.f32.xlu0 %v892_v55 }
 0x131   : > { %v1314_v56 = vpop.eup %1313  ;;  %v619_v57 = vadd.f32 %v616_v50, %v1642_v63  ;;  %v618_v59 = vmul.f32 0.6931472, %v1312_v24 }
 0x132   : > { %v709_v60 = vadd.f32 %v706_v53, %v1644_v0  ;;  %v708_v62 = vmul.f32 0.6931472, %v1314_v56 }
 0x133   : > { %v635_v10 = vsub.f32 %v619_v57, %v628_v58  ;;  %v620_v13 = vadd.f32 %v618_v59, %v1646_v2  ;;  %v584_v2 = vld [vmem:[#allocation2] sm:$0x3] }
 0x134   : > { %v725_v5 = vsub.f32 %v709_v60, %v718_v61  ;;  %v710_v9 = vadd.f32 %v708_v62, %v1648_v3 }
 0x135   : > { %v648_v14 = vmul.f32 %v1603_v21, %v635_v10  ;;  %v636_v15 = vsub.f32 %v620_v13, %v634_v6 }
 0x136   : > { %v727_v63 = vmul.f32 %v725_v5, %v1603_v21  ;;  %v726_v17 = vsub.f32 %v710_v9, %v724_v11 }
 0x137   : > { %v649_v1 = vmul.f32 %v1608_v22, %v636_v15 }
 0x138   : > { %v728_v0 = vmul.f32 %v726_v17, %v1608_v22  ;;  %v904_v22 = vld [vmem:[#allocation5] sm:$0x3] }
 0x139   : > { %v652_v18 = vcombine.low %v648_v14, %v649_v1  ;;  %v909_v4 = vrot.slane %v904_v22, %v1576_v7  ;;  %v913_v40 = vrot.slane %v904_v22, %v1579_v8 }
 0x13a   : > { %v731_v19 = vcombine.low %v727_v63, %v728_v0 }
 0x13b   : > { %v659_v20 = vrot.slane %v652_v18, %v1682_v54  ;;  %v916_v38 = vsel %vm836_vm5, %v909_v4, 0.0  ;;  %v917_v39 = vsel %vm836_vm5, %v913_v40, 0.0 }
 0x13c   : > { %v738_v25 = vrot.slane %v731_v19, %v1682_v54  ;;  %v918_v41 = vadd.f32 %v917_v39, %v916_v38 }
 0x13d   : > { %v666_v3 = vrot.slane %v659_v20, %v1682_v54 }
 0x13e   : > { %v745_v27 = vrot.slane %v738_v25, %v1682_v54 }
 0x13f   : > { %v668_v28 = vadd.f32 %v666_v3, %v584_v2 }
 0x140   : > { %v747_v29 = vadd.f32 %v745_v27, %v674_v26 }
 0x141   : > { %673 = vst.msk [vmem:[#allocation2] sm:$0x3] %vm1546_vm0, %v668_v28 }
 0x142   : > { %748 = vst.msk [vmem:[#allocation3] sm:$0x3] %vm1546_vm0, %v747_v29 }
 0x148   : > { %v824_v21 = vld [vmem:[#allocation2] sm:$0x3] }
 0x149   : > { %v829_v30 = vrot.slane %v824_v21, %v1576_v7  ;;  %v833_v31 = vrot.slane %v824_v21, %v1579_v8  ;;  %v852_v32 = vld [vmem:[#allocation3] sm:$0x3] }
 0x14a   : > { %v857_v33 = vrot.slane %v852_v32, %v1576_v7  ;;  %v861_v54 = vrot.slane %v852_v32, %v1579_v8 }
 0x14b   : > { %v837_v34 = vsel %vm836_vm5, %v829_v30, 0.0  ;;  %v838_v35 = vsel %vm836_vm5, %v833_v31, 0.0 }
 0x14c   : > { %v839_v36 = vadd.f32 %v838_v35, %v837_v34  ;;  %v864_v37 = vsel %vm836_vm5, %v857_v33, 0.0  ;;  %v865_v42 = vsel %vm836_vm5, %v861_v54, 0.0 }
 0x14d   : > { %v866_v44 = vadd.f32 %v865_v42, %v864_v37 }
 0x14e   : > { %840 = vadd.xlane.f32.xlu1 %v839_v36 }
 0x152   : > { %867 = vadd.xlane.f32.xlu1 %v866_v44 }
 0x156   : > { %919 = vadd.xlane.f32.xlu1 %v918_v41 }
 0x157   : > { %1328 = shalt.err (!%p1325_p5)
}
 0x158   : > { %s1329_s18 = scalar_lea.hbm %s1738_s28, 256  ;;  %s1333_s0 = scalar_lea.hbm %s1850_s4, 512 }
 0x159   : > { %p1330_p6 = scmp.ne.s32.totalorder %s1738_s28, %s1329_s18  ;;  %p1334_p10 = scmp.lt.u32.totalorder %s1738_s28, %s1850_s4 }
 0x15a   : > { %p1335_p11 = scmp.lt.u32.totalorder %s1333_s0, %s1329_s18  ;;  %p1337_p13 = scmp.lt.u32.totalorder %s1329_s18, %s1738_s28 }
 0x15b   : > { %p1331_p7 = pnand %p1330_p6, %p1522_p4 }
 0x15c   : > { %p1336_p12 = por %p1335_p11, %p1334_p10 }
 0x15d   : > { %p1332_p9 = pneg %p1331_p7 }
 0x15e   : > { %p1338_p0 = por %p1337_p13, %p1336_p12 }
 0x160   : > { %p1339_p1 = pnand %p1338_p0, %p1332_p9 }
 0x162   : > { %1342 = shalt.err (!%p1339_p1)
}
 0x163   : > { %1234 = dma.vmem_to_hbm [thread:$0]  (%p1522_p4), %s965_s24, 256, %s1738_s28, %s931_s29  }
 0x164   : > { %s1851_s2 = sshll.u32 %s1417_s12, 8  ;;  %s980_s27 = sshll.u32 %s1633_s20, 4  ;;  %s981_s27 = int_to_ptr.vmem [resolvable:$true] %s980_s27 }
 0x165   : > { %s1763_s23 = scalar_lea.hbm %s1827_s5, %s1851_s2  ;;  %s936_s18 = scalar_lea.sflag [#allocation9], %s1621_s15 }
 0x166   : > { %s1343_s0 = scalar_lea.vmem %s981_s27, 256  ;;  %s1431_s1 = smov [#allocation8]  }
 0x167   : > { %p1344_p2 = scmp.ne.s32.totalorder %s981_s27, %s1343_s0  ;;  %s1347_s3 = sshll.u32 %s1431_s1, 4  ;;  %s1348_s3 = int_to_ptr.vmem [resolvable:$false] %s1347_s3 }
 0x168   : > { %s1349_s4 = scalar_lea.vmem %s1348_s3, 512  ;;  %p1350_p6 = scmp.lt.s32.totalorder %s981_s27, %s1348_s3 }
 0x169   : > { %p1345_p3 = pnand %p1344_p2, %p1522_p4  ;;  %p1351_p7 = scmp.lt.s32.totalorder %s1349_s4, %s1343_s0 }
 0x16b   : > { %p1346_p5 = pneg %p1345_p3  ;;  %p1352_p9 = por %p1351_p7, %p1350_p6 }
 0x16d   : > { %p1353_p10 = pnand %p1352_p9, %p1346_p5 }
 0x16f   : > { %1356 = shalt.err (!%p1353_p10)
}
 0x170   : > { %s1357_s12 = scalar_lea.hbm %s1763_s23, 256  ;;  %s1361_s24 = scalar_lea.hbm %s1827_s5, 512 }
 0x171   : > { %p1358_p11 = scmp.ne.s32.totalorder %s1763_s23, %s1357_s12  ;;  %p1362_p0 = scmp.lt.u32.totalorder %s1763_s23, %s1827_s5 }
 0x172   : > { %p1363_p1 = scmp.lt.u32.totalorder %s1361_s24, %s1357_s12  ;;  %p1365_p3 = scmp.lt.u32.totalorder %s1357_s12, %s1763_s23 }
 0x173   : > { %p1359_p12 = pnand %p1358_p11, %p1522_p4 }
 0x174   : > { %p1364_p2 = por %p1363_p1, %p1362_p0 }
 0x175   : > { %p1360_p13 = pneg %p1359_p12 }
 0x176   : > { %p1366_p5 = por %p1365_p3, %p1364_p2 }
 0x178   : > { %p1367_p6 = pnand %p1366_p5, %p1360_p13 }
 0x17a   : > { %1370 = shalt.err (!%p1367_p6)
}
 0x17b   : > { %1235 = dma.vmem_to_hbm [thread:$0]  (%p1522_p4), %s981_s27, 256, %s1763_s23, %s936_s18   ;;  %vm850_vm0 = vcmask 0  }
 0x17c   : > { %s431_s29 = scalar_lea.vmem %s1828_s6, %s1544_s25  ;;  %s434_s23 = scalar_lea.vmem %s1829_s7, %s1544_s25 }
 0x17d   : > { %s437_s1 = scalar_lea.vmem %s1830_s8, %s1544_s25  ;;  %s440_s24 = scalar_lea.vmem %s1831_s9, %s1544_s25 }
 0x1bd   : > { %v894_v7 = vpop.xlane.xlu0 %893 }
 0x1be   : > { %v895_v8 = vrot.slane %v894_v7, 4 }
 0x1c0   : > { %v896_v43 = vadd.f32 %v895_v8, %v894_v7 }
 0x1c2   : > { %v897_v48 = vrot.slane %v896_v43, 2 }
 0x1c4   : > { %v898_v16 = vadd.f32 %v897_v48, %v896_v43 }
 0x1c6   : > { %v899_v59 = vrot.slane %v898_v16, 1 }
 0x1c8   : > { %v900_v13 = vadd.f32 %v899_v59, %v898_v16 }
 0x1db   : > { %v841_v45 = vpop.xlane.xlu1 %840 }
 0x1dc   : > { %v842_v46 = vrot.slane %v841_v45, 4 }
 0x1de   : > { %v843_v47 = vadd.f32 %v842_v46, %v841_v45 }
 0x1df   : > { %v868_v23 = vpop.xlane.xlu1 %867 }
 0x1e0   : > { %v844_v49 = vrot.slane %v843_v47, 2  ;;  %v869_v50 = vrot.slane %v868_v23, 4 }
 0x1e2   : > { %v870_v51 = vadd.f32 %v869_v50, %v868_v23  ;;  %v845_v52 = vadd.f32 %v844_v49, %v843_v47 }
 0x1e3   : > { %v920_v24 = vpop.xlane.xlu1 %919 }
 0x1e4   : > { %v871_v53 = vrot.slane %v870_v51, 2  ;;  %v921_v12 = vrot.slane %v920_v24, 4  ;;  %v846_v55 = vrot.slane %v845_v52, 1 }
 0x1e6   : > { %v922_v56 = vadd.f32 %v921_v12, %v920_v24  ;;  %v847_v57 = vadd.f32 %v846_v55, %v845_v52  ;;  %v872_v58 = vadd.f32 %v871_v53, %v870_v51 }
 0x1e8   : > { %v923_v60 = vrot.slane %v922_v56, 2  ;;  %1226 = vpush %v847_v57  ;;  %v873_v61 = vrot.slane %v872_v58, 1 }
 0x1ea   : > { %v924_v62 = vadd.f32 %v923_v60, %v922_v56  ;;  %v874_v10 = vadd.f32 %v873_v61, %v872_v58 }
 0x1ec   : > { %1228 = vpush %v874_v10  ;;  %v925_v6 = vrot.slane %v924_v62, 1 }
 0x1ed   : > { %1230 = vpush %v900_v13 }
 0x1ee   : > { %v926_v5 = vadd.f32 %v925_v6, %v924_v62 }
 0x1f0   : > { %1232 = vpush %v926_v5 }
 0x219   : > { %s1227_s2 = spop %1226 }
 0x21a   : > { %v849_v9 = vstv %s1227_s2 }
 0x21b   : > { %851 = vst.msk [vmem:[%s431_s29] sm:$0x1] %vm850_vm0, %v849_v9 }
 0x21d   : > { %s1229_s27 = spop %1228 }
 0x21e   : > { %v876_v11 = vstv %s1229_s27  ;;  %s1231_s12 = spop %1230 }
 0x21f   : > { %877 = vst.msk [vmem:[%s434_s23] sm:$0x1] %vm850_vm0, %v876_v11  ;;  %v902_v14 = vstv %s1231_s12 }
 0x220   : > { %903 = vst.msk [vmem:[%s437_s1] sm:$0x1] %vm850_vm0, %v902_v14 }
 0x221   : > { %s1233_s28 = spop %1232 }
 0x222   : > { %v928_v15 = vstv %s1233_s28 }
 0x223   : > { %929 = vst.msk [vmem:[%s440_s24] sm:$0x1] %vm850_vm0, %v928_v15 }
 0x224 PF: > { %p1245_p4 = scmp.ge.s32.totalorder %s1425_s14, 2  ;;  %s1004_s3 = sand.u32 1, %s1405_s30  }
 0x225   : > { %s1005_s4 = scalar_lea.sflag [#allocation7], %s1004_s3 }
 0x226   : > { %p1239_p7 = pnand %p1245_p4, %p1529_p8 }
 0x228   : > { %1396 = dma.done.wait (!%p1239_p7), %s1005_s4, 256  }
 0x229   : > { %1398 = vsyncadd (!%p1239_p7), %s1005_s4, 4294967040  ;;  %s1014_s19 = scalar_lea.sflag [#allocation9], %s1004_s3 }
 0x22a   : > { %1400 = dma.done.wait (!%p1239_p7), %s1014_s19, 256  }
 0x22b   : > { %1402 = vsyncadd (!%p1239_p7), %s1014_s19, 4294967040  ;;  %s26_s14 = sadd.s32 1, %s1425_s14   ;;  %s1852_s30 = smov %s1409_s10 }
 0x22c   : > { %p23_p9 = scmp.ge.s32.totalorder %s26_s14, 4   ;;  %s1853_s10 = smov %s1413_s11 }
 0x22d   : > { %s1854_s11 = smov %s1535_s22  ;;  %s1855_s12 = smov %s1421_s13 }
 0x22e   : > { %s1856_s13 = smov %s1858_s17  ;;  %25 = sbr.rel (!%p23_p9) target bundleno = 12 (0xc), region = 147 }
 0x235   :  { %1043 = vsyncpa [#allocation7], 1 }
 0x236   :  { %1045 = vsyncpa [#allocation7 + $0x1], 1 }
 0x237   :  { %1046 = vsyncpa [#allocation9], 1 }
 0x238   :  { %1048 = vsyncpa [#allocation9 + $0x1], 1 }

</bundles_post_ra>
